<compile_context>
chip_gen: v7x
topology: tpu7x:2x2x1
jax: 0.10.0
libtpu: 0.0.40
codegen_flags: <defaults>
</compile_context>

<pallas_src>
import functools

import jax
import jax.numpy as jnp
from jax import lax
from jax.experimental import pallas as pl
from jax.experimental.pallas import tpu as pltpu


# ---------------------------------------------------------------------------
# Path 1: small-vocab path -- one-hot @ table on the MXU (table in VMEM).
# ---------------------------------------------------------------------------
def _onehot_matmul_kernel(ids_ref, table_ref, out_ref):
    # ids_ref:   (T, 1)  int32  (VMEM) -- tokens on sublanes, no XLU relayout
    # table_ref: (V, E)  f32    (VMEM, full table; small by dispatch construction)
    # out_ref:   (T, E)  f32    (VMEM)
    ids = ids_ref[...]                                          # (T, 1)
    tile = ids.shape[0]
    vocab = table_ref.shape[0]
    iota = lax.broadcasted_iota(jnp.int32, (tile, vocab), 1)    # (T, V)
    # 0/1 values are exact in bf16; halves the one-hot's on-chip footprint.
    onehot = (ids == iota).astype(jnp.bfloat16)                 # (T, V)
    out_ref[...] = jnp.dot(
        onehot, table_ref[...], preferred_element_type=jnp.float32
    ).astype(out_ref.dtype)


# ---------------------------------------------------------------------------
# Path 2: general path -- manual DMA row gather, table stays in HBM.
# ---------------------------------------------------------------------------
def _dma_gather_kernel(ids_ref, table_hbm, out_ref, row_buf, sems,
                       *, token_tile, num_slots):
    # ids_ref:   (padded,)       int32 SMEM (scalar prefetch)
    # table_hbm: (V, E)          f32   HBM (memory_space=pl.ANY)
    # out_ref:   (token_tile, E) f32   VMEM output block
    # row_buf:   (token_tile, E) f32   VMEM staging buffer
    # sems:      (num_slots,)    DMA semaphores (ring of in-flight copies)
    base = pl.program_id(0) * token_tile

    def start_row(t):
        tok = ids_ref[base + t]
        pltpu.make_async_copy(
            table_hbm.at[pl.ds(tok, 1)],
            row_buf.at[pl.ds(t, 1)],
            sems.at[t % num_slots],
        ).start()

    def wait_row(t):
        # Src index is irrelevant for the wait (only the byte count matters).
        pltpu.make_async_copy(
            table_hbm.at[pl.ds(0, 1)],
            row_buf.at[pl.ds(t, 1)],
            sems.at[t % num_slots],
        ).wait()

    @pl.loop(0, token_tile)
    def _(t):
        @pl.when(t >= num_slots)
        def _():
            wait_row(t - num_slots)   # free this sem slot before reusing it
        start_row(t)

    # Drain the last `num_slots` outstanding copies (static trip count).
    for i in range(num_slots):
        wait_row(token_tile - num_slots + i)

    out_ref[...] = row_buf[...]


def _vmem_limit(needed_bytes):
    # Explicit scoped-VMEM limit with headroom; floor 32 MiB, cap 48 MiB so it
    # stays portable to v7x's 64 MiB physical VMEM.
    return int(min(max(2 * needed_bytes + (2 << 20), 32 << 20), 48 << 20))


def embedding_forward(input_ids, table, *, token_tile=None, num_dma_slots=8):
    """Pallas equivalent of nn.Embedding forward.

    input_ids: (batch, seq) integer ids
    table:     (vocab_size, embed_width) float32 weight
    returns:   (batch, seq, embed_width) float32
    """
    batch, seq = input_ids.shape
    vocab, embed_w = table.shape
    n_tokens = batch * seq
    itemsize = table.dtype.itemsize
    table_bytes = vocab * embed_w * itemsize

    # Dispatch: only very small tables ride the MXU/one-hot path (so even a
    # double-buffered resident table is bounded); everything else uses the
    # HBM row gather, which has no table-residency requirement.
    small_table = vocab <= 2048 and table_bytes <= (2 << 20)

    if token_tile is None:
        token_tile = 256 if small_table else 512
    assert token_tile % 8 == 0 and token_tile >= num_dma_slots

    # TODO(synk): torch.nn.Embedding raises on out-of-range ids and supports
    # padding_idx; here out-of-range ids are clamped instead of raising.
    flat_ids = jnp.clip(input_ids.reshape(n_tokens).astype(jnp.int32), 0, vocab - 1)

    padded = pl.cdiv(n_tokens, token_tile) * token_tile
    if padded != n_tokens:
        flat_ids = jnp.pad(flat_ids, (0, padded - n_tokens))
    grid = (padded // token_tile,)

    if small_table:
        ids2d = flat_ids.reshape(padded, 1)
        vmem_needed = (2 * table_bytes                    # table (double-buffered)
                       + 2 * token_tile * embed_w * 4     # output tiles
                       + 2 * token_tile * 4               # ids tiles
                       + token_tile * vocab * 6)          # bf16 one-hot (+ f32 copy)
        cost = pl.CostEstimate(
            flops=2 * padded * vocab * embed_w,
            transcendentals=0,
            bytes_accessed=table_bytes + padded * 4 + padded * embed_w * itemsize,
        )
        out = pl.pallas_call(
            _onehot_matmul_kernel,
            out_shape=jax.ShapeDtypeStruct((padded, embed_w), table.dtype),
            grid_spec=pltpu.PrefetchScalarGridSpec(
                num_scalar_prefetch=0,
                grid=grid,
                in_specs=[
                    pl.BlockSpec((token_tile, 1), lambda i: (i, 0)),       # ids
                    pl.BlockSpec((vocab, embed_w), lambda i: (0, 0)),      # table
                ],
                out_specs=pl.BlockSpec((token_tile, embed_w), lambda i: (i, 0)),
            ),
            compiler_params=pltpu.CompilerParams(
                dimension_semantics=("parallel",),
                vmem_limit_bytes=_vmem_limit(vmem_needed),
            ),
            cost_estimate=cost,
        )(ids2d, table)
    else:
        vmem_needed = (token_tile * embed_w * itemsize        # staging buffer
                       + 2 * token_tile * embed_w * itemsize)  # output tiles
        cost = pl.CostEstimate(
            flops=0,
            transcendentals=0,
            bytes_accessed=padded * 4 + 2 * padded * embed_w * itemsize,
        )
        kernel = functools.partial(
            _dma_gather_kernel, token_tile=token_tile, num_slots=num_dma_slots)
        out = pl.pallas_call(
            kernel,
            out_shape=jax.ShapeDtypeStruct((padded, embed_w), table.dtype),
            grid_spec=pltpu.PrefetchScalarGridSpec(
                num_scalar_prefetch=1,                           # ids -> SMEM
                grid=grid,
                in_specs=[pl.BlockSpec(memory_space=pl.ANY)],    # table stays in HBM
                out_specs=pl.BlockSpec((token_tile, embed_w), lambda i, ids: (i, 0)),
                scratch_shapes=[
                    pltpu.VMEM((token_tile, embed_w), table.dtype),
                    pltpu.SemaphoreType.DMA((num_dma_slots,)),
                ],
            ),
            compiler_params=pltpu.CompilerParams(
                dimension_semantics=("parallel",),
                vmem_limit_bytes=_vmem_limit(vmem_needed),
            ),
            cost_estimate=cost,
        )(flat_ids, table)

    return out[:n_tokens].reshape(batch, seq, embed_w)


if __name__ == "__main__":
    key = jax.random.PRNGKey(0)
    k1, k2, k3, k4 = jax.random.split(key, 4)

    # --- Config A: small vocab -> MXU one-hot path --------------------------
    vocab_a, embed_a = 256, 128
    batch_a, seq_a = 2, 192            # 384 tokens -> padded to 512 (2 tiles of 256)
    table_a = jax.random.normal(k1, (vocab_a, embed_a), jnp.float32)
    ids_a = jax.random.randint(k2, (batch_a, seq_a), 0, vocab_a, dtype=jnp.int32)
    out_a = jax.block_until_ready(embedding_forward(ids_a, table_a))
    ref_a = table_a[ids_a]
    assert out_a.shape == (batch_a, seq_a, embed_a)
    assert jnp.allclose(out_a, ref_a, atol=1e-5, rtol=1e-5)

    # --- Config B: larger vocab -> HBM DMA row-gather path -------------------
    vocab_b, embed_b = 4096, 256
    batch_b, seq_b = 2, 300            # 600 tokens -> padded to 1024 (2 tiles of 512)
    table_b = jax.random.normal(k3, (vocab_b, embed_b), jnp.float32)
    ids_b = jax.random.randint(k4, (batch_b, seq_b), 0, vocab_b, dtype=jnp.int32)
    out_b = jax.block_until_ready(embedding_forward(ids_b, table_b))
    ref_b = table_b[ids_b]
    assert out_b.shape == (batch_b, seq_b, embed_b)
    assert jnp.allclose(out_b, ref_b, atol=1e-5, rtol=1e-5)

    print("KERNEL_OK")
</pallas_src>

<mosaic_0001>
module attributes {stable_mosaic.version = 11 : i64} {
  func.func @_onehot_matmul_kernel(%arg0: i32, %arg1: memref<256x1xi32, #tpu.memory_space<vmem>>, %arg2: memref<256x128xf32, #tpu.memory_space<vmem>>, %arg3: memref<256x128xf32, #tpu.memory_space<vmem>>) attributes {dimension_semantics = [#tpu.dimension_semantics<parallel>], iteration_bounds = array<i64: 2>, scalar_prefetch = 0 : i64, scratch_operands = 0 : i64, tpu.core_type = #tpu.core_type<tc>, window_params = [{transform_indices = @transform_0, window_bounds = array<i64: 256, 1>}, {pipeline_mode = #tpu.pipeline_mode<synchronous>, transform_indices = @transform_1, window_bounds = array<i64: 256, 128>}, {transform_indices = @transform_2, window_bounds = array<i64: 256, 128>}]} {
    %c0 = arith.constant 0 : index
    %c0_0 = arith.constant 0 : index
    %0 = vector.load %arg1[%c0, %c0_0] : memref<256x1xi32, #tpu.memory_space<vmem>>, vector<256x1xi32>
    %1 = tpu.iota {dimensions = array<i32: 1>} : vector<256x256xi32>
    %2 = vector.broadcast %0 : vector<256x1xi32> to vector<256x256xi32>
    %3 = arith.cmpi eq, %2, %1 : vector<256x256xi32>
    %4 = arith.extui %3 : vector<256x256xi1> to vector<256x256xi32>
    %5 = arith.sitofp %4 : vector<256x256xi32> to vector<256x256xf32>
    %6 = arith.truncf %5 : vector<256x256xf32> to vector<256x256xbf16>
    %c0_1 = arith.constant 0 : index
    %c0_2 = arith.constant 0 : index
    %7 = vector.load %arg2[%c0_1, %c0_2] : memref<256x128xf32, #tpu.memory_space<vmem>>, vector<256x128xf32>
    %cst = arith.constant dense<0.000000e+00> : vector<256x128xf32>
    %8 = tpu.matmul %6, %7, %cst {dimension_numbers = #tpu.dot_dimension_numbers<[1], [0], [0], [1], [0, 0, 1, 1], [], []>} : vector<256x256xbf16>, vector<256x128xf32>, vector<256x128xf32> -> vector<256x128xf32>
    %c0_3 = arith.constant 0 : index
    %c0_4 = arith.constant 0 : index
    %9 = vector.load %arg3[%c0_3, %c0_4] : memref<256x128xf32, #tpu.memory_space<vmem>>, vector<256x128xf32>
    tpu.vector_store %arg3[%c0_3, %c0_4], %8 {strides = array<i32>} : memref<256x128xf32, #tpu.memory_space<vmem>>, vector<256x128xf32>,
    return
  }
  func.func @transform_0(%arg0: i32) -> (i32, i32) {
    %c0_i32 = arith.constant 0 : i32
    %c0_i32_0 = arith.constant 0 : i32
    return %arg0, %c0_i32 : i32, i32
  }
  func.func @transform_1(%arg0: i32) -> (i32, i32) {
    %c0_i32 = arith.constant 0 : i32
    %c0_i32_0 = arith.constant 0 : i32
    %c0_i32_1 = arith.constant 0 : i32
    return %c0_i32, %c0_i32_0 : i32, i32
  }
  func.func @transform_2(%arg0: i32) -> (i32, i32) {
    %c0_i32 = arith.constant 0 : i32
    %c0_i32_0 = arith.constant 0 : i32
    return %arg0, %c0_i32 : i32, i32
  }
}

</mosaic_0001>

<bundles_post_ra>
// kernel: tpu_custom_call.1
= control target key start
LH: loop header
LB: loop body
LE: loop exit
PB: predicated region body
PF: predicated region fallthrough
CT: control target
= control target key end

     0   :  { %7 = vsyncpa [#allocation3], 0  ;;  %s1657_s0 = inlined_call_operand.vmem [shape: s32[512,1], index: 0, kind: input, shape index: {}]   ;;  %s1658_s1 = inlined_call_operand.vmem [shape: f32[256,128], index: 1, kind: input, shape index: {}]   ;;  %s1659_s2 = inlined_call_operand.hbm [shape: f32[512,128], index: 2, kind: output, shape index: {}]  }
   0x1   :  { %9 = vsyncpa [#allocation3 + $0x1], 0  ;;  %s1279_s9 = smov 0   ;;  %s1281_s10 = smov 0  }
   0x2   :  { %s1283_s11 = smov 0   ;;  %s1285_s12 = smov 0  }
   0x3 LB: > { %s1300_s13 = sadd.s32 4294967295, %s1257_s12   ;;  %s833_s14 = sadd.s32 4294967294, %s1257_s12   ;;  %s1257_s12 = sphi %s1285_s12, %s1667_s12   ;;  %s1253_s11 = sphi %s1283_s11, %s1666_s11   ;;  %s1249_s10 = sphi %s1281_s10, %s1665_s10   ;;  %s1245_s9 = sphi %s1279_s9, %s1664_s9  }
   0x4   : > { %s1304_s15 = sadd.s32 1, %s1257_s12   ;;  %s69_s16 = sadd.s32 1, %s1253_s11 }
   0x5   : > { %s66_s17 = ssub.s32 %s1257_s12, %s1304_s15  ;;  %p79_p0 = scmp.ne.s32.totalorder %s1253_s11, %s1249_s10 }
   0x6   : > { %p67_p1 = scmp.eq.s32.totalorder %s66_s17, 0  ;;  %p80_p2 = scmp.eq.s32.totalorder %s1300_s13, 1 }
   0x7   : > { %p85_p3 = scmp.ne.s32.totalorder %s1249_s10, %s1245_s9  ;;  %p86_p4 = scmp.eq.s32.totalorder %s833_s14, 1 }
   0x8   : > { %s1315_s18 = scalar_select %p67_p1, %s1253_s11, %s69_s16  }
   0x9   : > { %p1317_p5 = por %p80_p2, %p79_p0  ;;  %p1321_p6 = por %p86_p4, %p85_p3 }
   0xa   : > { %p836_p7 = scmp.ge.s32.totalorder %s1257_s12, 1  ;;  %p116_p8 = scmp.lt.s32.totalorder %s1257_s12, 3 }
   0xc   : > { %p117_p9 = pnand %p836_p7, %p116_p8 }
   0xd   : > { %s838_s21 = sshll.u32 (!%p117_p9), %s1300_s13, 5  ;;  %v516_v0 = vld [vmem:[%s1658_s1 + $0x80] sm:$0xff] (!%p117_p9)  ;;  %v517_v1 = vld [vmem:[%s1658_s1 + $0x88] sm:$0xff] (!%p117_p9)  ;;  %v1259_v3 = vmov (!%p117_p9), 0   ;;  %v518_v6 = vld [vmem:[%s1658_s1 + $0x90] sm:$0xff] (!%p117_p9)  ;;  %s973_s14 = sshll.u32 (!%p117_p9), %s1300_s13, 12 }
   0xe   : > { %120 = sbr.rel (%p117_p9) target bundleno = 451 (0x1c3), region = 28  ;;  %v500_v2 = vld [vmem:[%s1658_s1] sm:$0xff] (!%p117_p9)  ;;  %1194 = vset.pattern.permute.xlu1 (!%p117_p9), %v1259_v3  ;;  %1193 = vset.pattern.permute.xlu0 (!%p117_p9), %v1259_v3  ;;  %p139_p10 = scmp.lt.s32.totalorder (!%p117_p9), %s838_s21, 63  ;;  %v1102_v4 = vpack.c.bf16 (!%p117_p9), %v517_v1, %v516_v0  ;;  %v501_v5 = vld [vmem:[%s1658_s1 + $0x8] sm:$0xff] (!%p117_p9)  ;;  %v519_v7 = vld [vmem:[%s1658_s1 + $0x98] sm:$0xff] (!%p117_p9) }
   0xf   : > { %v1104_v8 = vpack.c.bf16 (!%p117_p9), %v501_v5, %v500_v2  ;;  %v1106_v9 = vpack.c.bf16 (!%p117_p9), %v519_v7, %v518_v6  ;;  %v502_v10 = vld [vmem:[%s1658_s1 + $0x10] sm:$0xff] (!%p117_p9)  ;;  %v503_v11 = vld [vmem:[%s1658_s1 + $0x18] sm:$0xff] (!%p117_p9)  ;;  %v520_v12 = vld [vmem:[%s1658_s1 + $0xa0] sm:$0xff] (!%p117_p9)  ;;  %s1607_s23 = scalar_lea.hbm (!%p117_p9), %s1659_s2, %s973_s14  ;;  %s1261_s25 = smov (!%p117_p9), [#allocation2]  }
  0x10   : > { %1103 = vmatprep.subr.bf16.mxu0 (!%p117_p9), %v1102_v4  ;;  %1134 = vmatprep.subr.bf16.mxu1 (!%p117_p9), %v1102_v4  ;;  %v521_v13 = vld [vmem:[%s1658_s1 + $0xa8] sm:$0xff] (!%p117_p9)  ;;  %v1108_v14 = vpack.c.bf16 (!%p117_p9), %v503_v11, %v502_v10  ;;  %v504_v16 = vld [vmem:[%s1658_s1 + $0x20] sm:$0xff] (!%p117_p9)  ;;  %v522_v18 = vld [vmem:[%s1658_s1 + $0xb0] sm:$0xff] (!%p117_p9)  ;;  %s1199_s26 = sshll.u32 (!%p117_p9), %s1261_s25, 4  ;;  %s1200_s26 = int_to_ptr.vmem [resolvable:$false] %s1199_s26 }
  0x11   : > { %1105 = vmatpush3.bf16.msra.mxu0 (!%p117_p9), %v1104_v8  ;;  %1142 = vmatpush3.bf16.msra.mxu1 (!%p117_p9), %v1104_v8  ;;  %v1110_v15 = vpack.c.bf16 (!%p117_p9), %v521_v13, %v520_v12  ;;  %v505_v17 = vld [vmem:[%s1658_s1 + $0x28] sm:$0xff] (!%p117_p9)  ;;  %v523_v21 = vld [vmem:[%s1658_s1 + $0xb8] sm:$0xff] (!%p117_p9)  ;;  %v506_v26 = vld [vmem:[%s1658_s1 + $0x30] sm:$0xff] (!%p117_p9)  ;;  %s1201_s28 = scalar_lea.vmem (!%p117_p9), %s1200_s26, 8192 }
  0x12   : > { %1107 = vmatprep.subr.bf16.mxu0 (!%p117_p9), %v1106_v9  ;;  %1135 = vmatprep.subr.bf16.mxu1 (!%p117_p9), %v1106_v9  ;;  %v1112_v24 = vpack.c.bf16 (!%p117_p9), %v505_v17, %v504_v16  ;;  %v1114_v25 = vpack.c.bf16 (!%p117_p9), %v523_v21, %v522_v18  ;;  %v507_v27 = vld [vmem:[%s1658_s1 + $0x38] sm:$0xff] (!%p117_p9)  ;;  %v524_v28 = vld [vmem:[%s1658_s1 + $0xc0] sm:$0xff] (!%p117_p9)  ;;  %v525_v29 = vld [vmem:[%s1658_s1 + $0xc8] sm:$0xff] (!%p117_p9)  ;;  %v177_v17 = vlaneseq (!%p117_p9) }
  0x13   : > { %v1116_v32 = vpack.c.bf16 (!%p117_p9), %v507_v27, %v506_v26  ;;  %v1118_v33 = vpack.c.bf16 (!%p117_p9), %v525_v29, %v524_v28  ;;  %v508_v34 = vld [vmem:[%s1658_s1 + $0x40] sm:$0xff] (!%p117_p9)  ;;  %v509_v35 = vld [vmem:[%s1658_s1 + $0x48] sm:$0xff] (!%p117_p9)  ;;  %v526_v36 = vld [vmem:[%s1658_s1 + $0xd0] sm:$0xff] (!%p117_p9)  ;;  %v1260_v27 = vmov (!%p117_p9), 1.0|1.0  }
  0x14   : > { %v1120_v39 = vpack.c.bf16 (!%p117_p9), %v509_v35, %v508_v34  ;;  %v527_v40 = vld [vmem:[%s1658_s1 + $0xd8] sm:$0xff] (!%p117_p9)  ;;  %v510_v42 = vld [vmem:[%s1658_s1 + $0x50] sm:$0xff] (!%p117_p9)  ;;  %v528_v44 = vld [vmem:[%s1658_s1 + $0xe0] sm:$0xff] (!%p117_p9)  ;;  %v1461_v18 = vand.u32 (!%p117_p9), 127, %v177_v17 }
  0x15   : > { %s1669_s21 = smov (!%p139_p10, %s838_s21), 63  ;;  %1109 = vmatpush3.bf16.msra.mxu0 %v1108_v14  ;;  %1143 = vmatpush3.bf16.msra.mxu1 %v1108_v14  ;;  %v1122_v41 = vpack.c.bf16 %v527_v40, %v526_v36  ;;  %v511_v43 = vld [vmem:[%s1658_s1 + $0x58] sm:$0xff]  ;;  %v529_v45 = vld [vmem:[%s1658_s1 + $0xe8] sm:$0xff]  ;;  %v512_v50 = vld [vmem:[%s1658_s1 + $0x60] sm:$0xff] }
  0x16   : > { %s839_s24 = sshll.u32 %s1669_s21, 3  ;;  %1111 = vmatprep.subr.bf16.mxu0 %v1110_v15  ;;  %1136 = vmatprep.subr.bf16.mxu1 %v1110_v15  ;;  %v1124_v48 = vpack.c.bf16 %v511_v43, %v510_v42  ;;  %v1126_v49 = vpack.c.bf16 %v529_v45, %v528_v44  ;;  %v513_v51 = vld [vmem:[%s1658_s1 + $0x68] sm:$0xff]  ;;  %v530_v52 = vld [vmem:[%s1658_s1 + $0xf0] sm:$0xff]  ;;  %v531_v53 = vld [vmem:[%s1658_s1 + $0xf8] sm:$0xff]  ;;  %v1464_v21 = vadd.s32 128, %v1461_v18 }
  0x17   : > { %s1361_s27 = scalar_lea.vmem %s1657_s0, %s839_s24  ;;  %v1128_v56 = vpack.c.bf16 %v513_v51, %v512_v50  ;;  %v1130_v57 = vpack.c.bf16 %v531_v53, %v530_v52  ;;  %v514_v58 = vld [vmem:[%s1658_s1 + $0x70] sm:$0xff]  ;;  %v515_v59 = vld [vmem:[%s1658_s1 + $0x78] sm:$0xff] }
  0x18   : > { %v161_v19 = vld [vmem:[%s1361_s27 + $0x80] sm:$0xff]  ;;  %v162_v22 = vld [vmem:[%s1361_s27 + $0x88] sm:$0xff]  ;;  %v148_v30 = vld [vmem:[%s1361_s27 + $0x18] sm:$0xff]  ;;  %v1132_v62 = vpack.c.bf16 %v515_v59, %v514_v58 }
  0x19   : > { %v145_v20 = vld [vmem:[%s1361_s27] sm:$0xff]  ;;  %229 = vperm.xlu1 %1194, %v161_v19   ;;  %v146_v23 = vld [vmem:[%s1361_s27 + $0x8] sm:$0xff]  ;;  %v147_v31 = vld [vmem:[%s1361_s27 + $0x10] sm:$0xff]  ;;  %1113 = vmatpush3.bf16.msra.mxu0 %v1112_v24 }
  0x1a   : > { %181 = vperm.xlu0 %1193, %v145_v20   ;;  %1144 = vmatpush3.bf16.msra.mxu1 %v1112_v24  ;;  %v164_v37 = vld [vmem:[%s1361_s27 + $0x98] sm:$0xff]  ;;  %v163_v38 = vld [vmem:[%s1361_s27 + $0x90] sm:$0xff]  ;;  %v150_v46 = vld [vmem:[%s1361_s27 + $0x28] sm:$0xff] }
  0x1b   : > { %1115 = vmatprep.subr.bf16.mxu0 %v1114_v25  ;;  %1137 = vmatprep.subr.bf16.mxu1 %v1114_v25  ;;  %v149_v47 = vld [vmem:[%s1361_s27 + $0x20] sm:$0xff]  ;;  %v166_v54 = vld [vmem:[%s1361_s27 + $0xa8] sm:$0xff]  ;;  %v152_v60 = vld [vmem:[%s1361_s27 + $0x38] sm:$0xff] }
  0x1c   : > { %v165_v55 = vld [vmem:[%s1361_s27 + $0xa0] sm:$0xff]  ;;  %v151_v61 = vld [vmem:[%s1361_s27 + $0x30] sm:$0xff]  ;;  %v168_v63 = vld [vmem:[%s1361_s27 + $0xb8] sm:$0xff] }
  0x1d   : > { %232 = vperm.xlu1 %1194, %v162_v22   ;;  %1117 = vmatpush3.bf16.msra.mxu0 %v1116_v32  ;;  %v167_v0 = vld [vmem:[%s1361_s27 + $0xb0] sm:$0xff]  ;;  %v154_v1 = vld [vmem:[%s1361_s27 + $0x48] sm:$0xff]  ;;  %v153_v2 = vld [vmem:[%s1361_s27 + $0x40] sm:$0xff] }
  0x1e   : > { %184 = vperm.xlu0 %1193, %v146_v23   ;;  %1145 = vmatpush3.bf16.msra.mxu1 %v1116_v32  ;;  %v170_v3 = vld [vmem:[%s1361_s27 + $0xc8] sm:$0xff]  ;;  %v169_v4 = vld [vmem:[%s1361_s27 + $0xc0] sm:$0xff]  ;;  %v156_v5 = vld [vmem:[%s1361_s27 + $0x58] sm:$0xff] }
  0x1f   : > { %1119 = vmatprep.subr.bf16.mxu0 %v1118_v33  ;;  %1138 = vmatprep.subr.bf16.mxu1 %v1118_v33  ;;  %v155_v6 = vld [vmem:[%s1361_s27 + $0x50] sm:$0xff]  ;;  %v172_v7 = vld [vmem:[%s1361_s27 + $0xd8] sm:$0xff]  ;;  %v158_v9 = vld [vmem:[%s1361_s27 + $0x68] sm:$0xff] }
  0x20   : > { %v171_v8 = vld [vmem:[%s1361_s27 + $0xd0] sm:$0xff]  ;;  %v157_v10 = vld [vmem:[%s1361_s27 + $0x60] sm:$0xff]  ;;  %v174_v11 = vld [vmem:[%s1361_s27 + $0xe8] sm:$0xff] }
  0x21   : > { %190 = vperm.xlu1 %1194, %v148_v30   ;;  %1121 = vmatpush3.bf16.msra.mxu0 %v1120_v39  ;;  %v173_v12 = vld [vmem:[%s1361_s27 + $0xe0] sm:$0xff]  ;;  %v160_v13 = vld [vmem:[%s1361_s27 + $0x78] sm:$0xff]  ;;  %v159_v14 = vld [vmem:[%s1361_s27 + $0x70] sm:$0xff] }
  0x22   : > { %187 = vperm.xlu0 %1193, %v147_v31   ;;  %1146 = vmatpush3.bf16.msra.mxu1 %v1120_v39  ;;  %v176_v15 = vld [vmem:[%s1361_s27 + $0xf8] sm:$0xff]  ;;  %v175_v16 = vld [vmem:[%s1361_s27 + $0xf0] sm:$0xff]  ;;  %s135_s27 = sand.u32 1, %s1249_s10  }
  0x23   : > { %1123 = vmatprep.subr.bf16.mxu0 %v1122_v41  ;;  %1139 = vmatprep.subr.bf16.mxu1 %v1122_v41  ;;  %s837_s7 = sshll.u32 %s135_s27, 8  ;;  %s1616_s13 = scalar_lea.sflag [#allocation3], %s135_s27 }
  0x24   : > { %s1571_s8 = scalar_lea.vmem [#allocation2], %s837_s7 }
  0x25   : > { %238 = vperm.xlu1 %1194, %v164_v37   ;;  %1125 = vmatpush3.bf16.msra.mxu0 %v1124_v48  ;;  %s771_s16 = sshll.u32 %s1571_s8, 4  ;;  %s1609_s16 = int_to_ptr.vmem [resolvable:$true] %s771_s16 }
  0x26   : > { %235 = vperm.xlu0 %1193, %v163_v38   ;;  %1147 = vmatpush3.bf16.msra.mxu1 %v1124_v48  ;;  %s1195_s24 = scalar_lea.vmem %s1609_s16, 4096  ;;  %p1202_p0 = scmp.lt.s32.totalorder %s1609_s16, %s1200_s26 }
  0x27   : > { %1127 = vmatprep.subr.bf16.mxu0 %v1126_v49  ;;  %1140 = vmatprep.subr.bf16.mxu1 %v1126_v49  ;;  %p1196_p11 = scmp.ne.s32.totalorder %s1609_s16, %s1195_s24  ;;  %p1203_p1 = scmp.lt.s32.totalorder %s1201_s28, %s1195_s24 }
  0x29   : > { %196 = vperm.xlu1 %1194, %v150_v46   ;;  %1129 = vmatpush3.bf16.msra.mxu0 %v1128_v56  ;;  %p1197_p12 = pnand %p1196_p11, %p1317_p5  ;;  %p1204_p2 = por %p1203_p1, %p1202_p0 }
  0x2a   : > { %193 = vperm.xlu0 %1193, %v149_v47   ;;  %1148 = vmatpush3.bf16.msra.mxu1 %v1128_v56 }
  0x2b   : > { %1131 = vmatprep.subr.bf16.mxu0 %v1130_v57  ;;  %1141 = vmatprep.subr.bf16.mxu1 %v1130_v57  ;;  %p1198_p13 = pneg %p1197_p12 }
  0x2d   : > { %244 = vperm.xlu1 %1194, %v166_v54   ;;  %1133 = vmatpush3.bf16.msra.mxu0 %v1132_v62  ;;  %p1205_p3 = pnand %p1204_p2, %p1198_p13 }
  0x2e   : > { %241 = vperm.xlu0 %1193, %v165_v55   ;;  %1149 = vmatpush3.bf16.msra.mxu1 %v1132_v62 }
  0x31   : > { %202 = vperm.xlu1 %1194, %v152_v60  }
  0x32   : > { %199 = vperm.xlu0 %1193, %v151_v61  }
  0x35   : > { %250 = vperm.xlu1 %1194, %v168_v63  }
  0x36   : > { %247 = vperm.xlu0 %1193, %v167_v0  }
  0x39   : > { %208 = vperm.xlu1 %1194, %v154_v1  }
  0x3a   : > { %205 = vperm.xlu0 %1193, %v153_v2  }
  0x3d   : > { %256 = vperm.xlu1 %1194, %v170_v3  }
  0x3e   : > { %253 = vperm.xlu0 %1193, %v169_v4  }
  0x41   : > { %214 = vperm.xlu1 %1194, %v156_v5  }
  0x42   : > { %211 = vperm.xlu0 %1193, %v155_v6  }
  0x45   : > { %262 = vperm.xlu1 %1194, %v172_v7  }
  0x46   : > { %259 = vperm.xlu0 %1193, %v171_v8  }
  0x49   : > { %220 = vperm.xlu1 %1194, %v158_v9  }
  0x4a   : > { %217 = vperm.xlu0 %1193, %v157_v10  }
  0x4d   : > { %268 = vperm.xlu1 %1194, %v174_v11  }
  0x4e   : > { %265 = vperm.xlu0 %1193, %v173_v12  }
  0x51   : > { %226 = vperm.xlu1 %1194, %v160_v13  }
  0x52   : > { %223 = vperm.xlu0 %1193, %v159_v14  }
  0x55   : > { %274 = vperm.xlu1 %1194, %v176_v15  }
  0x56   : > { %271 = vperm.xlu0 %1193, %v175_v16  }
  0x98   : > { %v230_v19 = vpop.permute.xlu1 %229 }
  0x99   : > { %v182_v20 = vpop.permute.xlu0 %181  ;;  %vm308_vm0 = vcmp.eq.s32.totalorder %v230_v19, %v1461_v18  ;;  %vm309_vm10 = vcmp.eq.s32.totalorder %v230_v19, %v1464_v21 }
  0x9a   : > { %vm276_vm4 = vcmp.eq.s32.totalorder %v182_v20, %v1461_v18  ;;  %vm277_vm8 = vcmp.eq.s32.totalorder %v182_v20, %v1464_v21 }
  0x9c   : > { %v233_v22 = vpop.permute.xlu1 %232 }
  0x9d   : > { %v185_v23 = vpop.permute.xlu0 %184  ;;  %vm310_vm1 = vcmp.eq.s32.totalorder %v233_v22, %v1461_v18  ;;  %vm311_vm6 = vcmp.eq.s32.totalorder %v233_v22, %v1464_v21 }
  0x9e   : > { %vm278_vm2 = vcmp.eq.s32.totalorder %v185_v23, %v1461_v18  ;;  %vm279_vm3 = vcmp.eq.s32.totalorder %v185_v23, %v1464_v21  ;;  %vm1471_vm5 = vmpackc.low %vm310_vm1, %vm308_vm0 }
  0x9f   : > { %vm906_vm7 = vmpackc.low %vm278_vm2, %vm276_vm4 }
  0xa0   : > { %vm904_vm9 = vmpackc.low %vm279_vm3, %vm277_vm8  ;;  %v191_v25 = vpop.permute.xlu1 %190 }
  0xa1   : > { %v188_v26 = vpop.permute.xlu0 %187  ;;  %905 = vmatprep.mubr.msk.bf16.mxu0 %vm904_vm9, %v1260_v27  ;;  %vm936_vm11 = vmpackc.low %vm311_vm6, %vm309_vm10  ;;  %vm283_vm12 = vcmp.eq.s32.totalorder %v191_v25, %v1464_v21  ;;  %vm282_vm3 = vcmp.eq.s32.totalorder %v191_v25, %v1461_v18 }
  0xa2   : > { %vm281_vm13 = vcmp.eq.s32.totalorder %v188_v26, %v1464_v21  ;;  %937 = vmatprep.mubr.msk.bf16.mxu1 %vm936_vm11, %v1260_v27  ;;  %907 = vmatmul.mubr.msk.bf16.vlgmr.msra.gmra.mrb[0].mxu0 %vm906_vm7, %v1260_v27  ;;  %vm280_vm4 = vcmp.eq.s32.totalorder %v188_v26, %v1461_v18 }
  0xa3   : > { %vm908_vm14 = vmpackc.low %vm283_vm12, %vm281_vm13  ;;  %939 = vmatmul.mubr.msk.bf16.vlgmr.msra.gmra.mrb[0].mxu1 %vm1471_vm5, %v1260_v27 }
  0xa4   : > { %909 = vmatprep.mubr.msk.bf16.mxu0 %vm908_vm14, %v1260_v27  ;;  %v239_v28 = vpop.permute.xlu1 %238  ;;  %vm910_vm7 = vmpackc.low %vm282_vm3, %vm280_vm4 }
  0xa5   : > { %v236_v29 = vpop.permute.xlu0 %235  ;;  %vm314_vm15 = vcmp.eq.s32.totalorder %v239_v28, %v1461_v18  ;;  %vm315_vm0 = vcmp.eq.s32.totalorder %v239_v28, %v1464_v21 }
  0xa6   : > { %vm312_vm1 = vcmp.eq.s32.totalorder %v236_v29, %v1461_v18  ;;  %vm313_vm2 = vcmp.eq.s32.totalorder %v236_v29, %v1464_v21 }
  0xa7   : > { %vm940_vm6 = vmpackc.low %vm315_vm0, %vm313_vm2 }
  0xa8   : > { %941 = vmatprep.mubr.msk.bf16.mxu1 %vm940_vm6, %v1260_v27  ;;  %vm942_vm5 = vmpackc.low %vm314_vm15, %vm312_vm1  ;;  %v197_v30 = vpop.permute.xlu1 %196 }
  0xa9   : > { %v194_v31 = vpop.permute.xlu0 %193  ;;  %vm287_vm8 = vcmp.eq.s32.totalorder %v197_v30, %v1464_v21  ;;  %vm286_vm15 = vcmp.eq.s32.totalorder %v197_v30, %v1461_v18 }
  0xaa   : > { %vm285_vm9 = vcmp.eq.s32.totalorder %v194_v31, %v1464_v21  ;;  %911 = vmatmul.mubr.msk.bf16.gmra.mrb[4].mxu0 %vm910_vm7, %v1260_v27  ;;  %vm284_vm0 = vcmp.eq.s32.totalorder %v194_v31, %v1461_v18 }
  0xab   : > { %vm912_vm10 = vmpackc.low %vm287_vm8, %vm285_vm9  ;;  %943 = vmatmul.mubr.msk.bf16.gmra.mrb[4].mxu1 %vm942_vm5, %v1260_v27 }
  0xac   : > { %913 = vmatprep.mubr.msk.bf16.mxu0 %vm912_vm10, %v1260_v27  ;;  %v245_v32 = vpop.permute.xlu1 %244  ;;  %vm914_vm3 = vmpackc.low %vm286_vm15, %vm284_vm0 }
  0xad   : > { %v242_v33 = vpop.permute.xlu0 %241  ;;  %vm318_vm11 = vcmp.eq.s32.totalorder %v245_v32, %v1461_v18  ;;  %vm319_vm12 = vcmp.eq.s32.totalorder %v245_v32, %v1464_v21 }
  0xae   : > { %vm316_vm13 = vcmp.eq.s32.totalorder %v242_v33, %v1461_v18  ;;  %vm317_vm14 = vcmp.eq.s32.totalorder %v242_v33, %v1464_v21 }
  0xaf   : > { %vm944_vm1 = vmpackc.low %vm319_vm12, %vm317_vm14 }
  0xb0   : > { %945 = vmatprep.mubr.msk.bf16.mxu1 %vm944_vm1, %v1260_v27  ;;  %vm946_vm2 = vmpackc.low %vm318_vm11, %vm316_vm13  ;;  %v203_v34 = vpop.permute.xlu1 %202 }
  0xb1   : > { %v200_v35 = vpop.permute.xlu0 %199  ;;  %vm291_vm4 = vcmp.eq.s32.totalorder %v203_v34, %v1464_v21  ;;  %vm290_vm11 = vcmp.eq.s32.totalorder %v203_v34, %v1461_v18 }
  0xb2   : > { %vm289_vm6 = vcmp.eq.s32.totalorder %v200_v35, %v1464_v21  ;;  %915 = vmatmul.mubr.msk.bf16.gmra.mrb[8].mxu0 %vm914_vm3, %v1260_v27  ;;  %vm288_vm12 = vcmp.eq.s32.totalorder %v200_v35, %v1461_v18 }
  0xb3   : > { %vm916_vm5 = vmpackc.low %vm291_vm4, %vm289_vm6  ;;  %947 = vmatmul.mubr.msk.bf16.gmra.mrb[8].mxu1 %vm946_vm2, %v1260_v27 }
  0xb4   : > { %917 = vmatprep.mubr.msk.bf16.mxu0 %vm916_vm5, %v1260_v27  ;;  %v251_v36 = vpop.permute.xlu1 %250  ;;  %vm918_vm15 = vmpackc.low %vm290_vm11, %vm288_vm12 }
  0xb5   : > { %v248_v37 = vpop.permute.xlu0 %247  ;;  %vm322_vm7 = vcmp.eq.s32.totalorder %v251_v36, %v1461_v18  ;;  %vm323_vm8 = vcmp.eq.s32.totalorder %v251_v36, %v1464_v21 }
  0xb6   : > { %vm320_vm9 = vcmp.eq.s32.totalorder %v248_v37, %v1461_v18  ;;  %vm321_vm10 = vcmp.eq.s32.totalorder %v248_v37, %v1464_v21 }
  0xb7   : > { %vm948_vm13 = vmpackc.low %vm323_vm8, %vm321_vm10 }
  0xb8   : > { %949 = vmatprep.mubr.msk.bf16.mxu1 %vm948_vm13, %v1260_v27  ;;  %vm950_vm14 = vmpackc.low %vm322_vm7, %vm320_vm9  ;;  %v209_v38 = vpop.permute.xlu1 %208 }
  0xb9   : > { %v206_v39 = vpop.permute.xlu0 %205  ;;  %vm295_vm0 = vcmp.eq.s32.totalorder %v209_v38, %v1464_v21  ;;  %vm294_vm7 = vcmp.eq.s32.totalorder %v209_v38, %v1461_v18 }
  0xba   : > { %vm293_vm1 = vcmp.eq.s32.totalorder %v206_v39, %v1464_v21  ;;  %919 = vmatmul.mubr.msk.bf16.gmra.mrb[12].mxu0 %vm918_vm15, %v1260_v27  ;;  %vm292_vm8 = vcmp.eq.s32.totalorder %v206_v39, %v1461_v18 }
  0xbb   : > { %vm920_vm2 = vmpackc.low %vm295_vm0, %vm293_vm1  ;;  %951 = vmatmul.mubr.msk.bf16.gmra.mrb[12].mxu1 %vm950_vm14, %v1260_v27 }
  0xbc   : > { %921 = vmatprep.mubr.msk.bf16.mxu0 %vm920_vm2, %v1260_v27  ;;  %v257_v40 = vpop.permute.xlu1 %256  ;;  %vm922_vm11 = vmpackc.low %vm294_vm7, %vm292_vm8 }
  0xbd   : > { %v254_v41 = vpop.permute.xlu0 %253  ;;  %vm326_vm3 = vcmp.eq.s32.totalorder %v257_v40, %v1461_v18  ;;  %vm327_vm4 = vcmp.eq.s32.totalorder %v257_v40, %v1464_v21 }
  0xbe   : > { %vm324_vm6 = vcmp.eq.s32.totalorder %v254_v41, %v1461_v18  ;;  %vm325_vm5 = vcmp.eq.s32.totalorder %v254_v41, %v1464_v21 }
  0xbf   : > { %vm952_vm9 = vmpackc.low %vm327_vm4, %vm325_vm5 }
  0xc0   : > { %953 = vmatprep.mubr.msk.bf16.mxu1 %vm952_vm9, %v1260_v27  ;;  %vm954_vm10 = vmpackc.low %vm326_vm3, %vm324_vm6  ;;  %v215_v42 = vpop.permute.xlu1 %214 }
  0xc1   : > { %v212_v43 = vpop.permute.xlu0 %211  ;;  %vm299_vm12 = vcmp.eq.s32.totalorder %v215_v42, %v1464_v21  ;;  %vm298_vm3 = vcmp.eq.s32.totalorder %v215_v42, %v1461_v18 }
  0xc2   : > { %vm297_vm13 = vcmp.eq.s32.totalorder %v212_v43, %v1464_v21  ;;  %923 = vmatmul.mubr.msk.bf16.gmra.mrb[16].mxu0 %vm922_vm11, %v1260_v27  ;;  %vm296_vm4 = vcmp.eq.s32.totalorder %v212_v43, %v1461_v18 }
  0xc3   : > { %vm924_vm14 = vmpackc.low %vm299_vm12, %vm297_vm13  ;;  %955 = vmatmul.mubr.msk.bf16.gmra.mrb[16].mxu1 %vm954_vm10, %v1260_v27 }
  0xc4   : > { %925 = vmatprep.mubr.msk.bf16.mxu0 %vm924_vm14, %v1260_v27  ;;  %v263_v44 = vpop.permute.xlu1 %262  ;;  %vm926_vm7 = vmpackc.low %vm298_vm3, %vm296_vm4 }
  0xc5   : > { %v260_v45 = vpop.permute.xlu0 %259  ;;  %vm330_vm15 = vcmp.eq.s32.totalorder %v263_v44, %v1461_v18  ;;  %vm331_vm0 = vcmp.eq.s32.totalorder %v263_v44, %v1464_v21 }
  0xc6   : > { %vm328_vm1 = vcmp.eq.s32.totalorder %v260_v45, %v1461_v18  ;;  %vm329_vm2 = vcmp.eq.s32.totalorder %v260_v45, %v1464_v21 }
  0xc7   : > { %vm956_vm6 = vmpackc.low %vm331_vm0, %vm329_vm2 }
  0xc8   : > { %957 = vmatprep.mubr.msk.bf16.mxu1 %vm956_vm6, %v1260_v27  ;;  %vm958_vm5 = vmpackc.low %vm330_vm15, %vm328_vm1  ;;  %v221_v46 = vpop.permute.xlu1 %220 }
  0xc9   : > { %v218_v47 = vpop.permute.xlu0 %217  ;;  %vm303_vm8 = vcmp.eq.s32.totalorder %v221_v46, %v1464_v21  ;;  %vm302_vm15 = vcmp.eq.s32.totalorder %v221_v46, %v1461_v18 }
  0xca   : > { %vm301_vm9 = vcmp.eq.s32.totalorder %v218_v47, %v1464_v21  ;;  %927 = vmatmul.mubr.msk.bf16.gmra.mrb[20].mxu0 %vm926_vm7, %v1260_v27  ;;  %vm300_vm0 = vcmp.eq.s32.totalorder %v218_v47, %v1461_v18 }
  0xcb   : > { %vm928_vm10 = vmpackc.low %vm303_vm8, %vm301_vm9  ;;  %959 = vmatmul.mubr.msk.bf16.gmra.mrb[20].mxu1 %vm958_vm5, %v1260_v27 }
  0xcc   : > { %929 = vmatprep.mubr.msk.bf16.mxu0 %vm928_vm10, %v1260_v27  ;;  %v269_v48 = vpop.permute.xlu1 %268  ;;  %vm930_vm3 = vmpackc.low %vm302_vm15, %vm300_vm0 }
  0xcd   : > { %v266_v49 = vpop.permute.xlu0 %265  ;;  %vm334_vm11 = vcmp.eq.s32.totalorder %v269_v48, %v1461_v18  ;;  %vm335_vm12 = vcmp.eq.s32.totalorder %v269_v48, %v1464_v21 }
  0xce   : > { %vm332_vm13 = vcmp.eq.s32.totalorder %v266_v49, %v1461_v18  ;;  %vm333_vm14 = vcmp.eq.s32.totalorder %v266_v49, %v1464_v21 }
  0xcf   : > { %vm960_vm1 = vmpackc.low %vm335_vm12, %vm333_vm14 }
  0xd0   : > { %961 = vmatprep.mubr.msk.bf16.mxu1 %vm960_vm1, %v1260_v27  ;;  %vm962_vm2 = vmpackc.low %vm334_vm11, %vm332_vm13  ;;  %v227_v50 = vpop.permute.xlu1 %226 }
  0xd1   : > { %v224_v51 = vpop.permute.xlu0 %223  ;;  %vm307_vm4 = vcmp.eq.s32.totalorder %v227_v50, %v1464_v21  ;;  %vm306_vm11 = vcmp.eq.s32.totalorder %v227_v50, %v1461_v18 }
  0xd2   : > { %vm305_vm6 = vcmp.eq.s32.totalorder %v224_v51, %v1464_v21  ;;  %931 = vmatmul.mubr.msk.bf16.gmra.mrb[24].mxu0 %vm930_vm3, %v1260_v27  ;;  %vm304_vm12 = vcmp.eq.s32.totalorder %v224_v51, %v1461_v18 }
  0xd3   : > { %vm932_vm5 = vmpackc.low %vm307_vm4, %vm305_vm6  ;;  %963 = vmatmul.mubr.msk.bf16.gmra.mrb[24].mxu1 %vm962_vm2, %v1260_v27 }
  0xd4   : > { %933 = vmatprep.mubr.msk.bf16.mxu0 %vm932_vm5, %v1260_v27  ;;  %v275_v52 = vpop.permute.xlu1 %274  ;;  %vm934_vm15 = vmpackc.low %vm306_vm11, %vm304_vm12 }
  0xd5   : > { %v272_v53 = vpop.permute.xlu0 %271  ;;  %vm338_vm7 = vcmp.eq.s32.totalorder %v275_v52, %v1461_v18  ;;  %vm339_vm8 = vcmp.eq.s32.totalorder %v275_v52, %v1464_v21 }
  0xd6   : > { %vm336_vm9 = vcmp.eq.s32.totalorder %v272_v53, %v1461_v18  ;;  %vm337_vm10 = vcmp.eq.s32.totalorder %v272_v53, %v1464_v21 }
  0xd7   : > { %vm964_vm13 = vmpackc.low %vm339_vm8, %vm337_vm10 }
  0xd8   : > { %965 = vmatprep.mubr.msk.bf16.mxu1 %vm964_vm13, %v1260_v27  ;;  %vm966_vm14 = vmpackc.low %vm338_vm7, %vm336_vm9 }
  0xda   : > { %935 = vmatmul.mubr.msk.bf16.gmra.mrb[28].mxu0 %vm934_vm15, %v1260_v27 }
  0xdb   : > { %967 = vmatmul.mubr.msk.bf16.gmra.mrb[28].mxu1 %vm966_vm14, %v1260_v27 }
 0x175   : > { %v1006_v54 = vpop.f32.mrb[0].mxu0 }
 0x176   : > { %v1054_v55 = vpop.f32.mrb[0].mxu1  ;;  %v1007_v56 = vpop.f32.mrb[1].mxu0 }
 0x177   : > { %v1008_v57 = vadd.f32 %v1007_v56, %v1006_v54  ;;  %v1055_v58 = vpop.f32.mrb[1].mxu1  ;;  %v1009_v59 = vpop.f32.mrb[2].mxu0 }
 0x178   : > { %v1056_v60 = vadd.f32 %v1055_v58, %v1054_v55  ;;  %v1057_v61 = vpop.f32.mrb[2].mxu1  ;;  %v1010_v62 = vpop.f32.mrb[3].mxu0 }
 0x179   : > { %725 = vst [vmem:[%s1571_s8] sm:$0xff] %v1008_v57  ;;  %v1011_v63 = vadd.f32 %v1010_v62, %v1009_v59  ;;  %v1058_v0 = vpop.f32.mrb[3].mxu1 }
 0x17a   : > { %741 = vst [vmem:[%s1571_s8 + $0x80] sm:$0xff] %v1056_v60  ;;  %v1059_v1 = vadd.f32 %v1058_v0, %v1057_v61 }
 0x17b   : > { %726 = vst [vmem:[%s1571_s8 + $0x8] sm:$0xff] %v1011_v63 }
 0x17c   : > { %742 = vst [vmem:[%s1571_s8 + $0x88] sm:$0xff] %v1059_v1 }
 0x17d   : > { %v1012_v2 = vpop.f32.mrb[4].mxu0 }
 0x17e   : > { %v1060_v3 = vpop.f32.mrb[4].mxu1  ;;  %v1013_v4 = vpop.f32.mrb[5].mxu0 }
 0x17f   : > { %v1014_v5 = vadd.f32 %v1013_v4, %v1012_v2  ;;  %v1061_v6 = vpop.f32.mrb[5].mxu1  ;;  %v1015_v7 = vpop.f32.mrb[6].mxu0 }
 0x180   : > { %v1062_v8 = vadd.f32 %v1061_v6, %v1060_v3  ;;  %v1063_v9 = vpop.f32.mrb[6].mxu1  ;;  %v1016_v10 = vpop.f32.mrb[7].mxu0 }
 0x181   : > { %727 = vst [vmem:[%s1571_s8 + $0x10] sm:$0xff] %v1014_v5  ;;  %v1017_v11 = vadd.f32 %v1016_v10, %v1015_v7  ;;  %v1064_v12 = vpop.f32.mrb[7].mxu1 }
 0x182   : > { %743 = vst [vmem:[%s1571_s8 + $0x90] sm:$0xff] %v1062_v8  ;;  %v1065_v13 = vadd.f32 %v1064_v12, %v1063_v9 }
 0x183   : > { %728 = vst [vmem:[%s1571_s8 + $0x18] sm:$0xff] %v1017_v11 }
 0x184   : > { %744 = vst [vmem:[%s1571_s8 + $0x98] sm:$0xff] %v1065_v13 }
 0x185   : > { %v1018_v14 = vpop.f32.mrb[8].mxu0 }
 0x186   : > { %v1066_v15 = vpop.f32.mrb[8].mxu1  ;;  %v1019_v16 = vpop.f32.mrb[9].mxu0 }
 0x187   : > { %v1020_v17 = vadd.f32 %v1019_v16, %v1018_v14  ;;  %v1067_v18 = vpop.f32.mrb[9].mxu1  ;;  %v1021_v19 = vpop.f32.mrb[10].mxu0 }
 0x188   : > { %v1068_v20 = vadd.f32 %v1067_v18, %v1066_v15  ;;  %v1069_v21 = vpop.f32.mrb[10].mxu1  ;;  %v1022_v22 = vpop.f32.mrb[11].mxu0 }
 0x189   : > { %729 = vst [vmem:[%s1571_s8 + $0x20] sm:$0xff] %v1020_v17  ;;  %v1023_v23 = vadd.f32 %v1022_v22, %v1021_v19  ;;  %v1070_v24 = vpop.f32.mrb[11].mxu1 }
 0x18a   : > { %745 = vst [vmem:[%s1571_s8 + $0xa0] sm:$0xff] %v1068_v20  ;;  %v1071_v25 = vadd.f32 %v1070_v24, %v1069_v21 }
 0x18b   : > { %730 = vst [vmem:[%s1571_s8 + $0x28] sm:$0xff] %v1023_v23 }
 0x18c   : > { %746 = vst [vmem:[%s1571_s8 + $0xa8] sm:$0xff] %v1071_v25 }
 0x18d   : > { %v1024_v26 = vpop.f32.mrb[12].mxu0 }
 0x18e   : > { %v1072_v27 = vpop.f32.mrb[12].mxu1  ;;  %v1025_v28 = vpop.f32.mrb[13].mxu0 }
 0x18f   : > { %v1026_v29 = vadd.f32 %v1025_v28, %v1024_v26  ;;  %v1073_v30 = vpop.f32.mrb[13].mxu1  ;;  %v1027_v31 = vpop.f32.mrb[14].mxu0 }
 0x190   : > { %v1074_v32 = vadd.f32 %v1073_v30, %v1072_v27  ;;  %v1075_v33 = vpop.f32.mrb[14].mxu1  ;;  %v1028_v34 = vpop.f32.mrb[15].mxu0 }
 0x191   : > { %731 = vst [vmem:[%s1571_s8 + $0x30] sm:$0xff] %v1026_v29  ;;  %v1029_v35 = vadd.f32 %v1028_v34, %v1027_v31  ;;  %v1076_v36 = vpop.f32.mrb[15].mxu1 }
 0x192   : > { %747 = vst [vmem:[%s1571_s8 + $0xb0] sm:$0xff] %v1074_v32  ;;  %v1077_v37 = vadd.f32 %v1076_v36, %v1075_v33 }
 0x193   : > { %732 = vst [vmem:[%s1571_s8 + $0x38] sm:$0xff] %v1029_v35 }
 0x194   : > { %748 = vst [vmem:[%s1571_s8 + $0xb8] sm:$0xff] %v1077_v37 }
 0x195   : > { %v1030_v38 = vpop.f32.mrb[16].mxu0 }
 0x196   : > { %v1078_v39 = vpop.f32.mrb[16].mxu1  ;;  %v1031_v40 = vpop.f32.mrb[17].mxu0 }
 0x197   : > { %v1032_v41 = vadd.f32 %v1031_v40, %v1030_v38  ;;  %v1079_v42 = vpop.f32.mrb[17].mxu1  ;;  %v1033_v43 = vpop.f32.mrb[18].mxu0 }
 0x198   : > { %v1080_v44 = vadd.f32 %v1079_v42, %v1078_v39  ;;  %v1081_v45 = vpop.f32.mrb[18].mxu1  ;;  %v1034_v46 = vpop.f32.mrb[19].mxu0 }
 0x199   : > { %733 = vst [vmem:[%s1571_s8 + $0x40] sm:$0xff] %v1032_v41  ;;  %v1035_v47 = vadd.f32 %v1034_v46, %v1033_v43  ;;  %v1082_v48 = vpop.f32.mrb[19].mxu1 }
 0x19a   : > { %749 = vst [vmem:[%s1571_s8 + $0xc0] sm:$0xff] %v1080_v44  ;;  %v1083_v49 = vadd.f32 %v1082_v48, %v1081_v45 }
 0x19b   : > { %734 = vst [vmem:[%s1571_s8 + $0x48] sm:$0xff] %v1035_v47 }
 0x19c   : > { %750 = vst [vmem:[%s1571_s8 + $0xc8] sm:$0xff] %v1083_v49 }
 0x19d   : > { %v1036_v50 = vpop.f32.mrb[20].mxu0 }
 0x19e   : > { %v1084_v51 = vpop.f32.mrb[20].mxu1  ;;  %v1037_v52 = vpop.f32.mrb[21].mxu0 }
 0x19f   : > { %v1038_v53 = vadd.f32 %v1037_v52, %v1036_v50  ;;  %v1085_v54 = vpop.f32.mrb[21].mxu1  ;;  %v1039_v55 = vpop.f32.mrb[22].mxu0 }
 0x1a0   : > { %v1086_v56 = vadd.f32 %v1085_v54, %v1084_v51  ;;  %v1087_v57 = vpop.f32.mrb[22].mxu1  ;;  %v1040_v58 = vpop.f32.mrb[23].mxu0 }
 0x1a1   : > { %735 = vst [vmem:[%s1571_s8 + $0x50] sm:$0xff] %v1038_v53  ;;  %v1041_v59 = vadd.f32 %v1040_v58, %v1039_v55  ;;  %v1088_v60 = vpop.f32.mrb[23].mxu1 }
 0x1a2   : > { %751 = vst [vmem:[%s1571_s8 + $0xd0] sm:$0xff] %v1086_v56  ;;  %v1089_v61 = vadd.f32 %v1088_v60, %v1087_v57 }
 0x1a3   : > { %736 = vst [vmem:[%s1571_s8 + $0x58] sm:$0xff] %v1041_v59 }
 0x1a4   : > { %752 = vst [vmem:[%s1571_s8 + $0xd8] sm:$0xff] %v1089_v61 }
 0x1a5   : > { %v1042_v62 = vpop.f32.mrb[24].mxu0 }
 0x1a6   : > { %v1090_v63 = vpop.f32.mrb[24].mxu1  ;;  %v1043_v0 = vpop.f32.mrb[25].mxu0 }
 0x1a7   : > { %v1044_v1 = vadd.f32 %v1043_v0, %v1042_v62  ;;  %v1091_v2 = vpop.f32.mrb[25].mxu1  ;;  %v1045_v3 = vpop.f32.mrb[26].mxu0 }
 0x1a8   : > { %v1092_v4 = vadd.f32 %v1091_v2, %v1090_v63  ;;  %v1093_v5 = vpop.f32.mrb[26].mxu1  ;;  %v1046_v6 = vpop.f32.mrb[27].mxu0 }
 0x1a9   : > { %737 = vst [vmem:[%s1571_s8 + $0x60] sm:$0xff] %v1044_v1  ;;  %v1047_v7 = vadd.f32 %v1046_v6, %v1045_v3  ;;  %v1094_v8 = vpop.f32.mrb[27].mxu1 }
 0x1aa   : > { %753 = vst [vmem:[%s1571_s8 + $0xe0] sm:$0xff] %v1092_v4  ;;  %v1095_v9 = vadd.f32 %v1094_v8, %v1093_v5 }
 0x1ab   : > { %738 = vst [vmem:[%s1571_s8 + $0x68] sm:$0xff] %v1047_v7 }
 0x1ac   : > { %754 = vst [vmem:[%s1571_s8 + $0xe8] sm:$0xff] %v1095_v9 }
 0x1ad   : > { %v1048_v10 = vpop.f32.mrb[28].mxu0 }
 0x1ae   : > { %v1096_v11 = vpop.f32.mrb[28].mxu1  ;;  %v1049_v12 = vpop.f32.mrb[29].mxu0 }
 0x1af   : > { %v1050_v13 = vadd.f32 %v1049_v12, %v1048_v10  ;;  %v1097_v14 = vpop.f32.mrb[29].mxu1  ;;  %v1051_v15 = vpop.f32.mrb[30].mxu0 }
 0x1b0   : > { %v1098_v16 = vadd.f32 %v1097_v14, %v1096_v11  ;;  %v1099_v17 = vpop.f32.mrb[30].mxu1  ;;  %v1052_v18 = vpop.f32.mrb[31].mxu0 }
 0x1b1   : > { %739 = vst [vmem:[%s1571_s8 + $0x70] sm:$0xff] %v1050_v13  ;;  %v1053_v19 = vadd.f32 %v1052_v18, %v1051_v15  ;;  %v1100_v20 = vpop.f32.mrb[31].mxu1 }
 0x1b2   : > { %755 = vst [vmem:[%s1571_s8 + $0xf0] sm:$0xff] %v1098_v16  ;;  %v1101_v21 = vadd.f32 %v1100_v20, %v1099_v17 }
 0x1b3   : > { %740 = vst [vmem:[%s1571_s8 + $0x78] sm:$0xff] %v1053_v19 }
 0x1b4   : > { %756 = vst [vmem:[%s1571_s8 + $0xf8] sm:$0xff] %v1101_v21 }
 0x1b5   : > { %1208 = shalt.err (!%p1205_p3)
}
 0x1b6   : > { %s1209_s29 = scalar_lea.hbm %s1607_s23, 4096  ;;  %s1213_s21 = scalar_lea.hbm %s1659_s2, 8192 }
 0x1b7   : > { %p1210_p4 = scmp.ne.s32.totalorder %s1607_s23, %s1209_s29  ;;  %p1214_p9 = scmp.lt.u32.totalorder %s1607_s23, %s1659_s2 }
 0x1b8   : > { %p1215_p10 = scmp.lt.u32.totalorder %s1213_s21, %s1209_s29  ;;  %p1217_p12 = scmp.lt.u32.totalorder %s1209_s29, %s1607_s23 }
 0x1b9   : > { %p1211_p7 = pnand %p1210_p4, %p1317_p5 }
 0x1ba   : > { %p1216_p11 = por %p1215_p10, %p1214_p9 }
 0x1bb   : > { %p1212_p8 = pneg %p1211_p7 }
 0x1bc   : > { %p1218_p13 = por %p1217_p12, %p1216_p11 }
 0x1be   : > { %p1219_p0 = pnand %p1218_p13, %p1212_p8 }
 0x1c0   : > { %1222 = shalt.err (!%p1219_p0)
}
 0x1c1   : > { %s1262_s6 = smov 128   ;;  %s1263_s27 = smov 8  }
 0x1c2   : > { %1150 = dma.vmem_to_hbm [thread:$0]  (%p1317_p5), %s1609_s16, 4096, %s1607_s23, %s1616_s13, %s1262_s6, %s1262_s6, %s1263_s27  }
 0x1c3 PF: > { %p1156_p1 = scmp.ge.s32.totalorder %s1257_s12, 2  ;;  %s786_s7 = sand.u32 1, %s1245_s9  }
 0x1c4   : > { %s787_s8 = scalar_lea.sflag [#allocation3], %s786_s7 }
 0x1c5   : > { %p1153_p2 = pnand %p1156_p1, %p1321_p6 }
 0x1c7   : > { %1240 = dma.done.wait (!%p1153_p2), %s787_s8, 4096  }
 0x1c8   : > { %1242 = vsyncadd (!%p1153_p2), %s787_s8, 4294963200  ;;  %p12_p3 = scmp.ge.s32.totalorder %s1304_s15, 4   ;;  %s1664_s9 = smov %s1249_s10 }
 0x1c9   : > { %s1665_s10 = smov %s1253_s11  ;;  %s1666_s11 = smov %s1315_s18 }
 0x1ca   : > { %s1667_s12 = smov %s1304_s15  ;;  %14 = sbr.rel (!%p12_p3) target bundleno = 3 (0x3), region = 63 }
 0x1d1   :  { %792 = vsyncpa [#allocation3], 1 }
 0x1d2   :  { %794 = vsyncpa [#allocation3 + $0x1], 1 }

</bundles_post_ra>
